<compile_context>
chip_gen: v6e
topology: v6e:2x2x1
jax: 0.10.0
libtpu: 0.0.40
codegen_flags: <defaults>
</compile_context>

<pallas_src>
import functools

import jax
import jax.numpy as jnp
from jax import lax
from jax.experimental import pallas as pl
from jax.experimental.pallas import tpu as pltpu


def gcn_kernel(a_ref, x_ref, w_ref, b_ref, o_ref, *, linear_first):
    # a_ref: (Bb, N, N)   x_ref: (Bb, N, F_in)
    # w_ref: (F_in, Fp)   b_ref: (1, Fp)        o_ref: (Bb, N, Fp)
    a = a_ref[...].astype(jnp.float32)
    x = x_ref[...].astype(jnp.float32)
    w = w_ref[...]
    b = b_ref[...]

    # deg_i = sum_j A_ij + 1   (the +1 is the folded identity; no eye built)
    deg = jnp.sum(a, axis=-1, keepdims=True) + 1.0
    d = lax.rsqrt(deg)                                   # (Bb, N, 1) == deg**-0.5

    bb, n, f_in = x.shape
    fp = w.shape[1]

    if linear_first:
        # (A_hat @ X) @ W == A_hat @ (X @ W): do the Linear first when
        # F_out < F_in so the batched NxN matmul touches fewer features.
        y = jnp.dot(x.reshape(bb * n, f_in), w,
                    preferred_element_type=jnp.float32).reshape(bb, n, fp)
        ys = d * y                                       # (Bb, N, Fp)
        ay = jnp.einsum("bij,bjf->bif", a, ys,
                        preferred_element_type=jnp.float32) + ys
        out = d * ay + b                                 # bias broadcasts (1, Fp)
        o_ref[...] = jnp.maximum(out, 0.0).astype(o_ref.dtype)
    else:
        # A_hat @ X  ==  d_i * ( A @ (d_j * X) + (d_j * X) )
        xs = d * x                                       # (Bb, N, F_in)
        ax = jnp.einsum("bij,bjf->bif", a, xs,
                        preferred_element_type=jnp.float32) + xs
        ax = d * ax                                      # (Bb, N, F_in)
        # Linear + ReLU: fold batch into M -> one lane-dense MXU call.
        out = jnp.dot(ax.reshape(bb * n, f_in), w,
                      preferred_element_type=jnp.float32) + b
        out = jnp.maximum(out, 0.0)
        o_ref[...] = out.reshape(bb, n, fp).astype(o_ref.dtype)


def gcn_layer(X, A, W, b):
    """X: (B, N, F_in), A: (B, N, N), W: (F_in, F_out), b: (F_out,)."""
    B, N, F_in = X.shape
    F_out = W.shape[1]

    # Lane-dense padding of the output feature dim (multiple of 128); padded
    # W / bias columns are zero so padded outputs are exactly relu(0) == 0.
    Fp = pl.cdiv(F_out, 128) * 128
    Wp = jnp.zeros((F_in, Fp), jnp.float32).at[:, :F_out].set(
        W.astype(jnp.float32))
    bp = jnp.zeros((1, Fp), jnp.float32).at[0, :F_out].set(
        b.astype(jnp.float32))

    # Apply the Linear first when it shrinks the feature dim fed into the
    # batched N x N matmul (exact: matmul associativity).
    linear_first = F_out < F_in

    # Fuse batch elements per grid step: keep the per-step working set a few
    # MiB (well under default scoped VMEM even with double-buffering) while
    # amortizing per-step overhead and filling the MXU.
    feat = max(F_in, Fp) if linear_first else (F_in + Fp)
    bytes_per_elem = 4 * (N * N + N * feat + N * Fp)
    target_bytes = 4 * 1024 * 1024
    Bb = max(1, min(B, target_bytes // max(bytes_per_elem, 1)))
    while B % Bb != 0:  # keep a uniform grid
        Bb -= 1
    grid = (B // Bb,)

    kernel = functools.partial(gcn_kernel, linear_first=linear_first)

    out = pl.pallas_call(
        kernel,
        out_shape=jax.ShapeDtypeStruct((B, N, Fp), X.dtype),
        grid_spec=pltpu.PrefetchScalarGridSpec(
            num_scalar_prefetch=0,
            grid=grid,
            in_specs=[
                pl.BlockSpec((Bb, N, N), lambda i: (i, 0, 0)),
                pl.BlockSpec((Bb, N, F_in), lambda i: (i, 0, 0)),
                pl.BlockSpec((F_in, Fp), lambda i: (0, 0)),   # resident
                pl.BlockSpec((1, Fp), lambda i: (0, 0)),      # resident
            ],
            out_specs=pl.BlockSpec((Bb, N, Fp), lambda i: (i, 0, 0)),
        ),
        compiler_params=pltpu.CompilerParams(
            dimension_semantics=("parallel",)),
    )(A, X, Wp, bp)

    return out[..., :F_out] if Fp != F_out else out


def gcn_ref(X, A, W, b):
    B, N, _ = A.shape
    A = A + jnp.eye(N, dtype=A.dtype)[None]
    d = jnp.sum(A, axis=-1) ** (-0.5)
    A_hat = d[:, :, None] * A * d[:, None, :]
    AX = jnp.einsum("bij,bjf->bif", A_hat, X)
    return jax.nn.relu(jnp.einsum("bif,fo->bio", AX, W) + b)


if __name__ == "__main__":
    B, N, F_in, F_out = 2, 8, 16, 32

    key = jax.random.PRNGKey(0)
    kx, ka, kw, kb = jax.random.split(key, 4)

    X = jax.random.normal(kx, (B, N, F_in), dtype=jnp.float32)
    # Non-negative adjacency so rowsum^(-0.5) is well defined (typical GCN input).
    A = jax.random.uniform(ka, (B, N, N), dtype=jnp.float32)
    A = 0.5 * (A + jnp.transpose(A, (0, 2, 1)))  # symmetric adjacency

    # Deterministic nn.Linear-like parameters (W stored as (F_in, F_out) = weight.T).
    bound = 1.0 / (F_in ** 0.5)
    W = jax.random.uniform(kw, (F_in, F_out), minval=-bound, maxval=bound,
                           dtype=jnp.float32)
    bias = jax.random.uniform(kb, (F_out,), minval=-bound, maxval=bound,
                              dtype=jnp.float32)

    out = gcn_layer(X, A, W, bias)
    out = jax.block_until_ready(out)

    ref = gcn_ref(X, A, W, bias)
    assert out.shape == (B, N, F_out)
    assert jnp.allclose(out, ref, atol=1e-5, rtol=1e-5), "mismatch vs reference"

    print("KERNEL_OK")
</pallas_src>

<mosaic_0001>
module attributes {stable_mosaic.version = 11 : i64} {
  func.func @gcn_kernel(%arg0: i32, %arg1: memref<2x8x8xf32, #tpu.memory_space<vmem>>, %arg2: memref<2x8x16xf32, #tpu.memory_space<vmem>>, %arg3: memref<16x128xf32, #tpu.memory_space<vmem>>, %arg4: memref<1x128xf32, #tpu.memory_space<vmem>>, %arg5: memref<2x8x128xf32, #tpu.memory_space<vmem>>) attributes {dimension_semantics = [#tpu.dimension_semantics<parallel>], iteration_bounds = array<i64: 1>, scalar_prefetch = 0 : i64, scratch_operands = 0 : i64, tpu.core_type = #tpu.core_type<tc>, window_params = [{transform_indices = @transform_0, window_bounds = array<i64: 2, 8, 8>}, {transform_indices = @transform_1, window_bounds = array<i64: 2, 8, 16>}, {pipeline_mode = #tpu.pipeline_mode<synchronous>, transform_indices = @transform_2, window_bounds = array<i64: 16, 128>}, {pipeline_mode = #tpu.pipeline_mode<synchronous>, transform_indices = @transform_3, window_bounds = array<i64: 1, 128>}, {transform_indices = @transform_4, window_bounds = array<i64: 2, 8, 128>}]} {
    %c0 = arith.constant 0 : index
    %c0_0 = arith.constant 0 : index
    %c0_1 = arith.constant 0 : index
    %0 = vector.load %arg1[%c0, %c0_0, %c0_1] : memref<2x8x8xf32, #tpu.memory_space<vmem>>, vector<2x8x8xf32>
    %c0_2 = arith.constant 0 : index
    %c0_3 = arith.constant 0 : index
    %c0_4 = arith.constant 0 : index
    %1 = vector.load %arg2[%c0_2, %c0_3, %c0_4] : memref<2x8x16xf32, #tpu.memory_space<vmem>>, vector<2x8x16xf32>
    %c0_5 = arith.constant 0 : index
    %c0_6 = arith.constant 0 : index
    %2 = vector.load %arg3[%c0_5, %c0_6] : memref<16x128xf32, #tpu.memory_space<vmem>>, vector<16x128xf32>
    %c0_7 = arith.constant 0 : index
    %c0_8 = arith.constant 0 : index
    %3 = vector.load %arg4[%c0_7, %c0_8] : memref<1x128xf32, #tpu.memory_space<vmem>>, vector<1x128xf32>
    %cst = arith.constant dense<0.000000e+00> : vector<2x8xf32>
    %4 = vector.multi_reduction <add>, %0, %cst [2] : vector<2x8x8xf32> to vector<2x8xf32>
    %5 = vector.shape_cast %4 : vector<2x8xf32> to vector<2x8x1xf32>
    %cst_9 = arith.constant 1.000000e+00 : f32
    %6 = vector.broadcast %cst_9 : f32 to vector<2x8x1xf32>
    %7 = arith.addf %5, %6 : vector<2x8x1xf32>
    %8 = math.rsqrt %7 : vector<2x8x1xf32>
    %9 = vector.broadcast %8 : vector<2x8x1xf32> to vector<2x8x16xf32>
    %10 = arith.mulf %9, %1 : vector<2x8x16xf32>
    "tpu.trace_start"() <{level = 10 : i32, message = "bij,bjf->bif"}> : () -> ()
    %cst_10 = arith.constant dense<0.000000e+00> : vector<2x8x16xf32>
    %11 = tpu.matmul %0, %10, %cst_10 {dimension_numbers = #tpu.dot_dimension_numbers<[2], [1], [1], [2], [0, 0, 0, 1, 1, 2], [0], [0]>} : vector<2x8x8xf32>, vector<2x8x16xf32>, vector<2x8x16xf32> -> vector<2x8x16xf32>
    "tpu.trace_stop"() : () -> ()
    %12 = arith.addf %11, %10 : vector<2x8x16xf32>
    %13 = vector.broadcast %8 : vector<2x8x1xf32> to vector<2x8x16xf32>
    %14 = arith.mulf %13, %12 : vector<2x8x16xf32>
    %15 = vector.shape_cast %14 : vector<2x8x16xf32> to vector<16x16xf32>
    %cst_11 = arith.constant dense<0.000000e+00> : vector<16x128xf32>
    %16 = tpu.matmul %15, %2, %cst_11 {dimension_numbers = #tpu.dot_dimension_numbers<[1], [0], [0], [1], [0, 0, 1, 1], [], []>} : vector<16x16xf32>, vector<16x128xf32>, vector<16x128xf32> -> vector<16x128xf32>
    %17 = vector.broadcast %3 : vector<1x128xf32> to vector<16x128xf32>
    %18 = arith.addf %16, %17 : vector<16x128xf32>
    %cst_12 = arith.constant 0.000000e+00 : f32
    %19 = vector.broadcast %cst_12 : f32 to vector<16x128xf32>
    %20 = arith.maximumf %18, %19 : vector<16x128xf32>
    %21 = vector.shape_cast %20 : vector<16x128xf32> to vector<2x8x128xf32>
    %c0_13 = arith.constant 0 : index
    %c0_14 = arith.constant 0 : index
    %c0_15 = arith.constant 0 : index
    %22 = vector.load %arg5[%c0_13, %c0_14, %c0_15] : memref<2x8x128xf32, #tpu.memory_space<vmem>>, vector<2x8x128xf32>
    tpu.vector_store %arg5[%c0_13, %c0_14, %c0_15], %21 {strides = array<i32>} : memref<2x8x128xf32, #tpu.memory_space<vmem>>, vector<2x8x128xf32>,
    return
  }
  func.func @transform_0(%arg0: i32) -> (i32, i32, i32) {
    %c0_i32 = arith.constant 0 : i32
    %c0_i32_0 = arith.constant 0 : i32
    %c0_i32_1 = arith.constant 0 : i32
    return %arg0, %c0_i32, %c0_i32_0 : i32, i32, i32
  }
  func.func @transform_1(%arg0: i32) -> (i32, i32, i32) {
    %c0_i32 = arith.constant 0 : i32
    %c0_i32_0 = arith.constant 0 : i32
    %c0_i32_1 = arith.constant 0 : i32
    return %arg0, %c0_i32, %c0_i32_0 : i32, i32, i32
  }
  func.func @transform_2(%arg0: i32) -> (i32, i32) {
    %c0_i32 = arith.constant 0 : i32
    %c0_i32_0 = arith.constant 0 : i32
    %c0_i32_1 = arith.constant 0 : i32
    return %c0_i32, %c0_i32_0 : i32, i32
  }
  func.func @transform_3(%arg0: i32) -> (i32, i32) {
    %c0_i32 = arith.constant 0 : i32
    %c0_i32_0 = arith.constant 0 : i32
    %c0_i32_1 = arith.constant 0 : i32
    return %c0_i32, %c0_i32_0 : i32, i32
  }
  func.func @transform_4(%arg0: i32) -> (i32, i32, i32) {
    %c0_i32 = arith.constant 0 : i32
    %c0_i32_0 = arith.constant 0 : i32
    %c0_i32_1 = arith.constant 0 : i32
    return %arg0, %c0_i32, %c0_i32_0 : i32, i32, i32
  }
}

</mosaic_0001>

<bundles_post_ra>
// kernel: tpu_custom_call.1
= control target key start
LH: loop header
LB: loop body
LE: loop exit
PB: predicated region body
PF: predicated region fallthrough
CT: control target
= control target key end

     0   :  { %9 = vsyncpa [#allocation3], 0  ;;  %s529_s0 = inlined_call_operand.hbm [shape: f32[2,8,8], index: 0, kind: input, shape index: {}]   ;;  %s530_s1 = inlined_call_operand.hbm [shape: f32[2,8,16], index: 1, kind: input, shape index: {}]   ;;  %s531_s2 = inlined_call_operand.hbm [shape: f32[16,128], index: 2, kind: input, shape index: {}]   ;;  %s532_s3 = inlined_call_operand.vmem [shape: f32[1,128], index: 3, kind: input, shape index: {}]   ;;  %s533_s4 = inlined_call_operand.hbm [shape: f32[2,8,128], index: 4, kind: output, shape index: {}]  }
   0x1   :  { %10 = vsyncpa [#allocation6], 0 }
   0x2   :  { %11 = vsyncpa [#allocation4], 0  ;;  %s465_s15 = smov [#allocation5]   ;;  %s466_s17 = smov [#allocation2]  }
   0x3   :  { %s29_s16 = sshll.u32 %s465_s15, 4  ;;  %s17_s18 = sshll.u32 %s466_s17, 4  ;;  %s30_s16 = int_to_ptr.vmem [resolvable:$true] %s29_s16  ;;  %s18_s18 = int_to_ptr.vmem [resolvable:$true] %s17_s18 }
   0x4   :  { %s387_s19 = scalar_lea.vmem %s30_s16, 256  ;;  %p392_p1 = scmp.lt.s32.totalorder %s30_s16, %s30_s16 }
   0x5   :  { %p388_p0 = scmp.ne.s32.totalorder %s30_s16, %s387_s19  ;;  %p393_p2 = scmp.lt.s32.totalorder %s387_s19, %s387_s19 }
   0x7   :  { %p394_p3 = por %p393_p2, %p392_p1 }
   0x9   :  { %p395_p4 = pnand %p394_p3, %p388_p0 }
   0xb   :  { %398 = shalt.err (!%p395_p4)
}
   0xc   :  { %s467_s20 = smov 128   ;;  %s468_s21 = smov 8  }
   0xd   :  { %35 = dma.hbm_to_vmem [thread:$0]  %s530_s1, 256, %s30_s16, [#allocation6], %s467_s20, %s467_s20, %s468_s21  }
   0xe   :  { %s407_s24 = scalar_lea.vmem %s18_s18, 256  ;;  %p412_p6 = scmp.lt.s32.totalorder %s18_s18, %s18_s18 }
   0xf   :  { %p408_p5 = scmp.ne.s32.totalorder %s18_s18, %s407_s24  ;;  %p413_p7 = scmp.lt.s32.totalorder %s407_s24, %s407_s24 }
  0x11   :  { %p414_p8 = por %p413_p7, %p412_p6 }
  0x13   :  { %p415_p9 = pnand %p414_p8, %p408_p5 }
  0x15   :  { %418 = shalt.err (!%p415_p9)
}
  0x16   :  { %23 = dma.hbm_to_vmem [thread:$0]  %s529_s0, 256, %s18_s18, [#allocation3], %s467_s20, %s467_s20, %s468_s21  }
  0x17   :  { %s469_s27 = smov [#allocation7]  }
  0x18   :  { %s41_s28 = sshll.u32 %s469_s27, 4  ;;  %s42_s28 = int_to_ptr.vmem [resolvable:$true] %s41_s28 }
  0x19   :  { %s427_s29 = scalar_lea.vmem %s42_s28, 256  ;;  %p432_p11 = scmp.lt.s32.totalorder %s42_s28, %s42_s28 }
  0x1a   :  { %p428_p10 = scmp.ne.s32.totalorder %s42_s28, %s427_s29  ;;  %p433_p12 = scmp.lt.s32.totalorder %s427_s29, %s427_s29 }
  0x1c   :  { %p434_p13 = por %p433_p12, %p432_p11 }
  0x1e   :  { %p435_p0 = pnand %p434_p13, %p428_p10 }
  0x20   :  { %438 = shalt.err (!%p435_p0)
}
  0x21   :  { %47 = dma.hbm_to_vmem [thread:$0]  %s531_s2, 256, %s42_s28, [#allocation6], %s467_s20, %s467_s20, %s468_s21  }
  0x22   :  { %459 = dma.done.wait [#allocation3], 256  }
  0x23   :  { %460 = vsyncadd [#allocation3], 4294967040 }
  0x24   :  { %461 = dma.done.wait [#allocation6], 512  }
  0x25   :  { %462 = vsyncadd [#allocation6], 4294966784  ;;  %vm66_vm0 = vcmask 64512   ;;  %v59_v0 = vld [vmem:[#allocation2] sm:$0xff]  ;;  %v60_v1 = vld [vmem:[#allocation2 + $0x8] sm:$0xff]  ;;  %v470_v4 = vmov 0.0  }
  0x26   :  { %v67_v2 = vsel %vm66_vm0, %v59_v0, 0.0  ;;  %v70_v3 = vsel %vm66_vm0, %v60_v1, 0.0  ;;  %350 = vmatprep.subr.mxu0 %v470_v4  ;;  %355 = vmatprep.subr.mxu1 %v470_v4  ;;  %vm471_vm1 = vmmov 0   ;;  %v61_v9 = vld [vmem:[#allocation5] sm:$0xff]  ;;  %v62_v12 = vld [vmem:[#allocation5 + $0x8] sm:$0xff]  ;;  %v64_v15 = vld [vmem:[#allocation7 + $0x8] sm:$0xff] }
  0x27   :  { %68 = vadd.xlane.f32.xlu0 %v67_v2  ;;  %352 = vmatprep.mubr.msk.f32.mxu0 %vm471_vm1, %v470_v4  ;;  %v63_v16 = vld [vmem:[#allocation7] sm:$0xff]  ;;  %vm233_vm2 = vcmask 130048   ;;  %s472_s5 = smov [#allocation8]  }
  0x28   :  { %357 = vmatprep.mubr.msk.f32.mxu1 %vm471_vm1, %v470_v4  ;;  %v339_v25 = vld [vmem:[%s532_s3] ss:$0 sm:$0xff]  ;;  %s324_s6 = sshll.u32 %s472_s5, 4  ;;  %s325_s6 = int_to_ptr.vmem [resolvable:$true] %s324_s6 }
  0x29   :  { %s439_s7 = scalar_lea.vmem %s325_s6, 256  ;;  %p444_p2 = scmp.lt.s32.totalorder %s325_s6, %s325_s6 }
  0x2a   :  { %p440_p1 = scmp.ne.s32.totalorder %s325_s6, %s439_s7  ;;  %p445_p3 = scmp.lt.s32.totalorder %s439_s7, %s439_s7 }
  0x2b   :  { %71 = vadd.xlane.f32.xlu0 %v70_v3 }
  0x2c   :  { %p446_p4 = por %p445_p3, %p444_p2 }
  0x2e   :  { %p447_p5 = pnand %p446_p4, %p440_p1 }
  0xb0   :  { %v69_v5 = vpop.xlane.xlu0 %68 }
  0xb1   :  { %v73_v6 = vadd.f32 1.0, %v69_v5 }
  0xb3   :  { %375 = vrsqrt.f32 %v73_v6 }
  0xb4   :  { %v72_v7 = vpop.xlane.xlu0 %71 }
  0xb5   :  { %v74_v8 = vadd.f32 1.0, %v72_v7 }
  0xb7   :  { %377 = vrsqrt.f32 %v74_v8 }
  0xc0   :  { %v376_v10 = vpop.eup %375 }
  0xc1   :  { %v77_v11 = vmul.f32 %v376_v10, %v61_v9 }
  0xc3   :  { %351 = vmatpush3.msra.mxu0 %v77_v11 }
  0xc4   :  { %v378_v13 = vpop.eup %377  ;;  %353 = vmatmul.mubr.msk.f32.vlgmr.msra.gmra.mxu0 %vm66_vm0, %v59_v0  ;;  %360 = vmatprep.subr.mxu0 %v64_v15 }
  0xc5   :  { %v78_v14 = vmul.f32 %v378_v13, %v62_v12  ;;  %361 = vmatpush3.msra.mxu0 %v64_v15 }
  0xc6   :  { %362 = vmatprep.subr.mxu0 %v63_v16 }
  0xc7   :  { %356 = vmatpush3.msra.mxu1 %v78_v14  ;;  %363 = vmatpush3.msra.mxu0 %v63_v16 }
  0xc8   :  { %358 = vmatmul.mubr.msk.f32.vlgmr.msra.gmra.mxu1 %vm66_vm0, %v60_v1 }
 0x184   :  { %v148_v17 = vpop.f32.mrf.mxu0 }
 0x185   :  { %v149_v18 = vadd.f32 %v148_v17, %v77_v11 }
 0x186   :  { %v354_v19 = vpop.f32.mrf.mxu0 }
 0x187   :  { %v225_v20 = vmul.f32 %v376_v10, %v149_v18 }
 0x188   :  { %v221_v21 = vpop.f32.mrf.mxu1 }
 0x189   :  { %v222_v22 = vadd.f32 %v221_v21, %v78_v14  ;;  %364 = vmatprep.mubr.msk.f32.mxu0 %vm233_vm2, %v225_v20 }
 0x18a   :  { %v359_v23 = vpop.f32.mrf.mxu1 }
 0x18b   :  { %v226_v24 = vmul.f32 %v378_v13, %v222_v22 }
 0x18d   :  { %365 = vmatmul.mubr.msk.f32.vlgmr.msra.gmra.mxu0 %vm233_vm2, %v226_v24 }
 0x24d   :  { %v366_v26 = vpop.f32.mrf.mxu0 }
 0x24e   :  { %v312_v27 = vadd.f32 %v366_v26, %v339_v25 }
 0x24f   :  { %v306_v28 = vpop.f32.mrf.mxu0 }
 0x250   :  { %v316_v29 = vmax.f32 %v312_v27, 0.0  ;;  %v307_v30 = vadd.f32 %v339_v25, %v306_v28 }
 0x252   :  { %318 = vst [vmem:[#allocation8 + $0x8] sm:$0xff] %v316_v29  ;;  %v315_v31 = vmax.f32 %v307_v30, 0.0 }
 0x254   :  { %317 = vst [vmem:[#allocation8] sm:$0xff] %v315_v31 }
 0x255   :  { %450 = shalt.err (!%p447_p5)
}
 0x256   :  { %330 = dma.vmem_to_hbm [thread:$0]  %s325_s6, 256, %s533_s4, [#allocation4], %s467_s20, %s467_s20, %s468_s21  }
 0x257   :  { %463 = dma.done.wait [#allocation4], 256  }
 0x258   :  { %464 = vsyncadd [#allocation4], 4294967040 }
 0x259   :  { %334 = vsyncpa [#allocation3], 1 }
 0x25a   :  { %335 = vsyncpa [#allocation6], 1 }
 0x25b   :  { %336 = vsyncpa [#allocation4], 1 }

</bundles_post_ra>
